<compile_context>
chip_gen: v7x
topology: tpu7x:2x2x1
jax: 0.10.0
libtpu: 0.0.40
codegen_flags: <defaults>
</compile_context>

<pallas_src>
import jax
import jax.numpy as jnp
from jax.experimental import pallas as pl
from jax.experimental.pallas import tpu as pltpu


def _round_up(x: int, m: int) -> int:
    return (x + m - 1) // m * m


def _patch_embed_kernel(x_ref, w_ref, b_ref, o_ref):
    # x_ref: (TM, K)      -- M-tile of flattened patches
    # w_ref: (K, E_out)   -- projection weight (resident across grid)
    # b_ref: (1, E_out)   -- bias, f32 (resident across grid)
    # o_ref: (TM, E_out)
    acc = jnp.dot(x_ref[...], w_ref[...], preferred_element_type=jnp.float32)
    o_ref[...] = (acc + b_ref[...]).astype(o_ref.dtype)


def patch_embedding(x, weight, bias, patch_size, *, compute_dtype=None):
    """x: (B, C, H, W) NCHW (PyTorch conv convention).
    weight: (E, C, P, P) (PyTorch Conv2d weight), bias: (E,).
    compute_dtype: optional dtype for the matmul inputs (e.g. jnp.bfloat16 to
      run the MXU at full rate); accumulation is always f32.
    returns: (B, num_patches, E) in x.dtype."""
    B, C, H, W = x.shape
    P = patch_size
    nh, nw = H // P, W // P
    num_patches = nh * nw
    E = weight.shape[0]
    K = C * P * P
    M = B * num_patches

    # --- patch extraction (plain-JAX glue; flatten order (C,P,P) matches
    #     PyTorch Conv2d weight flattening) ---
    patches = x.reshape(B, C, nh, P, nw, P).transpose(0, 2, 4, 1, 3, 5)
    patches = patches.reshape(M, K)

    w_mat = weight.reshape(E, K).T                      # (K, E)
    b_mat = bias.reshape(1, E).astype(jnp.float32)      # bias stays f32

    cd = compute_dtype if compute_dtype is not None else x.dtype
    patches = patches.astype(cd)
    w_mat = w_mat.astype(cd)

    # --- pad only the (small) E axis, and only when needed, for lane-dense
    #     unmasked output stores.  The big patches array is never padded. ---
    E_out = E if E % 128 == 0 else _round_up(E, 128)
    if E_out != E:
        w_mat = jnp.pad(w_mat, ((0, 0), (0, E_out - E)))
        b_mat = jnp.pad(b_mat, ((0, 0), (0, E_out - E)))

    # --- M tile: biggest tile within a conservative VMEM budget (fits the
    #     16 MiB scoped default on v5e as well as v6e/v7x) ---
    in_bytes = jnp.dtype(cd).itemsize
    out_bytes = jnp.dtype(x.dtype).itemsize
    vmem_budget = 16 * 1024 * 1024

    def footprint(t):
        return (2 * t * K * in_bytes            # double-buffered patch tiles
                + K * E_out * in_bytes          # resident weight
                + E_out * 4                     # resident bias
                + 2 * t * E_out * out_bytes     # double-buffered output tiles
                + t * E_out * 4)                # f32 accumulator temporaries

    tm = min(512, _round_up(M, 8))
    while tm > 8 and footprint(tm) > vmem_budget:
        tm //= 2
    tm = max(8, _round_up(tm, 8))

    grid = (pl.cdiv(M, tm),)   # ragged last block is fine: OOB rows dropped

    out = pl.pallas_call(
        _patch_embed_kernel,
        out_shape=jax.ShapeDtypeStruct((M, E_out), x.dtype),
        grid_spec=pltpu.PrefetchScalarGridSpec(
            num_scalar_prefetch=0,
            grid=grid,
            in_specs=[
                pl.BlockSpec((tm, K), lambda i: (i, 0)),
                pl.BlockSpec((K, E_out), lambda i: (0, 0)),  # resident weight
                pl.BlockSpec((1, E_out), lambda i: (0, 0)),  # resident bias
            ],
            out_specs=pl.BlockSpec((tm, E_out), lambda i: (i, 0)),
        ),
        compiler_params=pltpu.CompilerParams(
            dimension_semantics=("parallel",)),
    )(patches, w_mat, b_mat)

    if E_out != E:
        out = out[:, :E]
    return out.reshape(B, num_patches, E)


def _reference(x, weight, bias, patch_size):
    # Plain-JAX reference: strided conv (== PyTorch Conv2d) + flatten + transpose.
    y = jax.lax.conv_general_dilated(
        x, weight,
        window_strides=(patch_size, patch_size),
        padding="VALID",
        dimension_numbers=("NCHW", "OIHW", "NCHW"),
    )
    y = y + bias.reshape(1, -1, 1, 1)
    B, E, hh, ww = y.shape
    return y.reshape(B, E, hh * ww).transpose(0, 2, 1)


if __name__ == "__main__":
    # Small shapes consistent with the module.
    batch = 2
    img_size = 16
    patch_size = 4
    in_channels = 4
    embed_dim = 32

    key = jax.random.PRNGKey(0)
    kx, kw, kb = jax.random.split(key, 3)

    x = jax.random.normal(kx, (batch, in_channels, img_size, img_size),
                          dtype=jnp.float32)
    # Deterministic synthetic parameters (Conv2d weight/bias shapes).
    weight = 0.02 * jax.random.normal(
        kw, (embed_dim, in_channels, patch_size, patch_size), dtype=jnp.float32)
    bias = 0.01 * jax.random.normal(kb, (embed_dim,), dtype=jnp.float32)

    ref = _reference(x, weight, bias, patch_size)

    # Full-precision path (matches PyTorch f32 semantics).
    out = patch_embedding(x, weight, bias, patch_size)
    out = jax.block_until_ready(out)
    assert out.shape == (batch, (img_size // patch_size) ** 2, embed_dim)
    assert jnp.allclose(out, ref, atol=1e-5, rtol=1e-5), "f32 mismatch vs reference"

    # bf16 matmul path (MXU full-rate option); f32 accumulation inside kernel.
    out_bf16 = patch_embedding(x, weight, bias, patch_size,
                               compute_dtype=jnp.bfloat16)
    out_bf16 = jax.block_until_ready(out_bf16)
    assert jnp.allclose(out_bf16, ref, atol=3e-2, rtol=3e-2), "bf16 mismatch vs reference"

    print("KERNEL_OK")
</pallas_src>

<mosaic_0001>
module attributes {stable_mosaic.version = 11 : i64} {
  func.func @_patch_embed_kernel(%arg0: i32, %arg1: memref<32x64xf32, #tpu.memory_space<vmem>>, %arg2: memref<64x128xf32, #tpu.memory_space<vmem>>, %arg3: memref<1x128xf32, #tpu.memory_space<vmem>>, %arg4: memref<32x128xf32, #tpu.memory_space<vmem>>) attributes {dimension_semantics = [#tpu.dimension_semantics<parallel>], iteration_bounds = array<i64: 1>, scalar_prefetch = 0 : i64, scratch_operands = 0 : i64, tpu.core_type = #tpu.core_type<tc>, window_params = [{transform_indices = @transform_0, window_bounds = array<i64: 32, 64>}, {pipeline_mode = #tpu.pipeline_mode<synchronous>, transform_indices = @transform_1, window_bounds = array<i64: 64, 128>}, {pipeline_mode = #tpu.pipeline_mode<synchronous>, transform_indices = @transform_2, window_bounds = array<i64: 1, 128>}, {transform_indices = @transform_3, window_bounds = array<i64: 32, 128>}]} {
    %c0 = arith.constant 0 : index
    %c0_0 = arith.constant 0 : index
    %0 = vector.load %arg1[%c0, %c0_0] : memref<32x64xf32, #tpu.memory_space<vmem>>, vector<32x64xf32>
    %c0_1 = arith.constant 0 : index
    %c0_2 = arith.constant 0 : index
    %1 = vector.load %arg2[%c0_1, %c0_2] : memref<64x128xf32, #tpu.memory_space<vmem>>, vector<64x128xf32>
    %cst = arith.constant dense<0.000000e+00> : vector<32x128xf32>
    %2 = tpu.matmul %0, %1, %cst {dimension_numbers = #tpu.dot_dimension_numbers<[1], [0], [0], [1], [0, 0, 1, 1], [], []>} : vector<32x64xf32>, vector<64x128xf32>, vector<32x128xf32> -> vector<32x128xf32>
    %c0_3 = arith.constant 0 : index
    %c0_4 = arith.constant 0 : index
    %3 = vector.load %arg3[%c0_3, %c0_4] : memref<1x128xf32, #tpu.memory_space<vmem>>, vector<1x128xf32>
    %4 = vector.broadcast %3 : vector<1x128xf32> to vector<32x128xf32>
    %5 = arith.addf %2, %4 : vector<32x128xf32>
    %c0_5 = arith.constant 0 : index
    %c0_6 = arith.constant 0 : index
    %6 = vector.load %arg4[%c0_5, %c0_6] : memref<32x128xf32, #tpu.memory_space<vmem>>, vector<32x128xf32>
    tpu.vector_store %arg4[%c0_5, %c0_6], %5 {strides = array<i32>} : memref<32x128xf32, #tpu.memory_space<vmem>>, vector<32x128xf32>,
    return
  }
  func.func @transform_0(%arg0: i32) -> (i32, i32) {
    %c0_i32 = arith.constant 0 : i32
    %c0_i32_0 = arith.constant 0 : i32
    return %arg0, %c0_i32 : i32, i32
  }
  func.func @transform_1(%arg0: i32) -> (i32, i32) {
    %c0_i32 = arith.constant 0 : i32
    %c0_i32_0 = arith.constant 0 : i32
    %c0_i32_1 = arith.constant 0 : i32
    return %c0_i32, %c0_i32_0 : i32, i32
  }
  func.func @transform_2(%arg0: i32) -> (i32, i32) {
    %c0_i32 = arith.constant 0 : i32
    %c0_i32_0 = arith.constant 0 : i32
    %c0_i32_1 = arith.constant 0 : i32
    return %c0_i32, %c0_i32_0 : i32, i32
  }
  func.func @transform_3(%arg0: i32) -> (i32, i32) {
    %c0_i32 = arith.constant 0 : i32
    %c0_i32_0 = arith.constant 0 : i32
    return %arg0, %c0_i32 : i32, i32
  }
}

</mosaic_0001>

<bundles_post_ra>
// kernel: tpu_custom_call.1
= control target key start
LH: loop header
LB: loop body
LE: loop exit
PB: predicated region body
PF: predicated region fallthrough
CT: control target
= control target key end

     0   :  { %8 = vsyncpa [#allocation3], 0  ;;  %s399_s0 = inlined_call_operand.hbm [shape: f32[32,64], index: 0, kind: input, shape index: {}]   ;;  %s400_s1 = inlined_call_operand.hbm [shape: f32[64,128], index: 1, kind: input, shape index: {}]   ;;  %s401_s2 = inlined_call_operand.vmem [shape: f32[1,128], index: 2, kind: input, shape index: {}]   ;;  %s402_s3 = inlined_call_operand.hbm [shape: f32[32,128], index: 3, kind: output, shape index: {}]  }
   0x1   :  { %9 = vsyncpa [#allocation6], 0 }
   0x2   :  { %10 = vsyncpa [#allocation4], 0  ;;  %s322_s12 = smov [#allocation2]   ;;  %s250_s16 = scalar_lea.hbm %s399_s0, 512 }
   0x3   :  { %s16_s13 = sshll.u32 %s322_s12, 4  ;;  %p251_p0 = scmp.ne.s32.totalorder %s399_s0, %s250_s16  ;;  %s17_s13 = int_to_ptr.vmem [resolvable:$true] %s16_s13 }
   0x4   :  { %p254_p1 = scmp.lt.u32.totalorder %s250_s16, %s399_s0 }
   0x6   :  { %p256_p2 = pnand %p254_p1, %p251_p0 }
   0x8   :  { %259 = shalt.err (!%p256_p2)
}
   0x9   :  { %s260_s21 = scalar_lea.vmem %s17_s13, 512  ;;  %p265_p4 = scmp.lt.s32.totalorder %s17_s13, %s17_s13 }
   0xa   :  { %p261_p3 = scmp.ne.s32.totalorder %s17_s13, %s260_s21  ;;  %p266_p5 = scmp.lt.s32.totalorder %s260_s21, %s260_s21 }
   0xc   :  { %p267_p6 = por %p266_p5, %p265_p4 }
   0xe   :  { %p268_p7 = pnand %p267_p6, %p261_p3 }
  0x10   :  { %271 = shalt.err (!%p268_p7)
}
  0x11   :  { %s323_s22 = smov 128   ;;  %s324_s23 = smov 8  }
  0x12   :  { %22 = dma.hbm_to_vmem [thread:$0]  %s399_s0, 512, %s17_s13, [#allocation3], %s323_s22, %s323_s22, %s324_s23  }
  0x13   :  { %s325_s26 = smov [#allocation5]   ;;  %s272_s30 = scalar_lea.hbm %s400_s1, 1024 }
  0x14   :  { %s28_s27 = sshll.u32 %s325_s26, 4  ;;  %p273_p8 = scmp.ne.s32.totalorder %s400_s1, %s272_s30  ;;  %s29_s27 = int_to_ptr.vmem [resolvable:$true] %s28_s27 }
  0x15   :  { %p276_p9 = scmp.lt.u32.totalorder %s272_s30, %s400_s1 }
  0x17   :  { %p278_p10 = pnand %p276_p9, %p273_p8 }
  0x19   :  { %281 = shalt.err (!%p278_p10)
}
  0x1a   :  { %s282_s8 = scalar_lea.vmem %s29_s27, 1024  ;;  %p287_p12 = scmp.lt.s32.totalorder %s29_s27, %s29_s27 }
  0x1b   :  { %p283_p11 = scmp.ne.s32.totalorder %s29_s27, %s282_s8  ;;  %p288_p13 = scmp.lt.s32.totalorder %s282_s8, %s282_s8 }
  0x1d   :  { %p289_p0 = por %p288_p13, %p287_p12 }
  0x1f   :  { %p290_p1 = pnand %p289_p0, %p283_p11 }
  0x21   :  { %293 = shalt.err (!%p290_p1)
}
  0x22   :  { %34 = dma.hbm_to_vmem [thread:$0]  %s400_s1, 1024, %s29_s27, [#allocation6], %s323_s22, %s323_s22, %s324_s23  }
  0x23   :  { %316 = dma.done.wait [#allocation3], 512  }
  0x24   :  { %317 = vsyncadd [#allocation3], 4294966784 }
  0x25   :  { %318 = dma.done.wait [#allocation6], 1024  }
  0x26   :  { %319 = vsyncadd [#allocation6], 4294966272  ;;  %v47_v0 = vld [vmem:[#allocation5] sm:$0xff]  ;;  %v48_v1 = vld [vmem:[#allocation5 + $0x8] sm:$0xff]  ;;  %vm62_vm0 = vcmask 523264   ;;  %s326_s11 = smov [#allocation7]  }
  0x27   :  { %v49_v2 = vld [vmem:[#allocation5 + $0x10] sm:$0xff]  ;;  %v221_v3 = vpack.c.bf16 %v48_v1, %v47_v0  ;;  %v50_v4 = vld [vmem:[#allocation5 + $0x18] sm:$0xff]  ;;  %v51_v6 = vld [vmem:[#allocation5 + $0x20] sm:$0xff]  ;;  %s169_s12 = sshll.u32 %s326_s11, 4  ;;  %s170_s12 = int_to_ptr.vmem [resolvable:$true] %s169_s12 }
  0x28   :  { %v225_v5 = vpack.c.bf16 %v50_v4, %v49_v2  ;;  %v52_v7 = vld [vmem:[#allocation5 + $0x28] sm:$0xff]  ;;  %v43_v8 = vld [vmem:[#allocation2] sm:$0xff]  ;;  %v45_v9 = vld [vmem:[#allocation2 + $0x10] sm:$0xff]  ;;  %s294_s13 = scalar_lea.vmem %s170_s12, 512  ;;  %p299_p3 = scmp.lt.s32.totalorder %s170_s12, %s170_s12 }
  0x29   :  { %222 = vmatprep.subr.bf16.mxu0 %v221_v3  ;;  %237 = vmatprep.subr.bf16.mxu1 %v221_v3  ;;  %v229_v10 = vpack.c.bf16 %v52_v7, %v51_v6  ;;  %v53_v11 = vld [vmem:[#allocation5 + $0x30] sm:$0xff]  ;;  %v54_v12 = vld [vmem:[#allocation5 + $0x38] sm:$0xff]  ;;  %v44_v14 = vld [vmem:[#allocation2 + $0x8] sm:$0xff]  ;;  %p295_p2 = scmp.ne.s32.totalorder %s170_s12, %s294_s13  ;;  %p300_p4 = scmp.lt.s32.totalorder %s294_s13, %s294_s13 }
  0x2a   :  { %224 = vmatpush3.bf16.msra.mxu0 %v221_v3  ;;  %241 = vmatpush3.bf16.msra.mxu1 %v221_v3  ;;  %v233_v13 = vpack.c.bf16 %v54_v12, %v53_v11  ;;  %v46_v15 = vld [vmem:[#allocation2 + $0x18] sm:$0xff]  ;;  %v182_v16 = vld [vmem:[%s401_s2] ss:$0 sm:$0xff] }
  0x2b   :  { %226 = vmatprep.subr.bf16.mxu0 %v225_v5  ;;  %238 = vmatprep.subr.bf16.mxu1 %v225_v5  ;;  %p301_p5 = por %p300_p4, %p299_p3 }
  0x2c   :  { %215 = vmatprep.mubr.msk.f32.mxu0 %vm62_vm0, %v43_v8  ;;  %218 = vmatprep.mubr.msk.f32.mxu1 %vm62_vm0, %v45_v9 }
  0x2d   :  { %p302_p6 = pnand %p301_p5, %p295_p2 }
  0x2e   :  { %228 = vmatpush3.bf16.msra.mxu0 %v225_v5  ;;  %242 = vmatpush3.bf16.msra.mxu1 %v225_v5 }
  0x2f   :  { %230 = vmatprep.subr.bf16.mxu0 %v229_v10  ;;  %239 = vmatprep.subr.bf16.mxu1 %v229_v10 }
  0x32   :  { %232 = vmatpush3.bf16.msra.mxu0 %v229_v10  ;;  %243 = vmatpush3.bf16.msra.mxu1 %v229_v10 }
  0x33   :  { %234 = vmatprep.subr.bf16.mxu0 %v233_v13  ;;  %240 = vmatprep.subr.bf16.mxu1 %v233_v13 }
  0x36   :  { %236 = vmatpush3.bf16.msra.mxu0 %v233_v13  ;;  %244 = vmatpush3.bf16.msra.mxu1 %v233_v13 }
  0x39   :  { %216 = vmatmul.mubr.msk.f32.vlgmr.msra.gmra.mrb[0].mxu0 %vm62_vm0, %v44_v14  ;;  %219 = vmatmul.mubr.msk.f32.vlgmr.msra.gmra.mrb[0].mxu1 %vm62_vm0, %v46_v15 }
 0x10c   :  { %v217_v17 = vpop.f32.mrb[0].mxu0  ;;  %v220_v18 = vpop.f32.mrb[0].mxu1 }
 0x10d   :  { %v147_v19 = vadd.f32 %v217_v17, %v182_v16  ;;  %v157_v20 = vadd.f32 %v220_v18, %v182_v16  ;;  %v141_v21 = vpop.f32.mrb[1].mxu0  ;;  %v151_v22 = vpop.f32.mrb[1].mxu1 }
 0x10e   :  { %v142_v23 = vadd.f32 %v182_v16, %v141_v21  ;;  %v152_v24 = vadd.f32 %v182_v16, %v151_v22 }
 0x10f   :  { %161 = vst [vmem:[#allocation7 + $0x8] sm:$0xff] %v147_v19  ;;  %163 = vst [vmem:[#allocation7 + $0x18] sm:$0xff] %v157_v20 }
 0x110   :  { %160 = vst [vmem:[#allocation7] sm:$0xff] %v142_v23  ;;  %162 = vst [vmem:[#allocation7 + $0x10] sm:$0xff] %v152_v24 }
 0x111   :  { %305 = shalt.err (!%p302_p6)
}
 0x112   :  { %s306_s15 = scalar_lea.hbm %s402_s3, 512 }
 0x113   :  { %p307_p7 = scmp.ne.s32.totalorder %s402_s3, %s306_s15  ;;  %p310_p8 = scmp.lt.u32.totalorder %s306_s15, %s402_s3 }
 0x115   :  { %p312_p9 = pnand %p310_p8, %p307_p7 }
 0x117   :  { %315 = shalt.err (!%p312_p9)
}
 0x118   :  { %175 = dma.vmem_to_hbm [thread:$0]  %s170_s12, 512, %s402_s3, [#allocation4], %s323_s22, %s323_s22, %s324_s23  }
 0x119   :  { %320 = dma.done.wait [#allocation4], 512  }
 0x11a   :  { %321 = vsyncadd [#allocation4], 4294966784 }
 0x11b   :  { %179 = vsyncpa [#allocation3], 1 }
 0x11c   :  { %180 = vsyncpa [#allocation6], 1 }
 0x11d   :  { %181 = vsyncpa [#allocation4], 1 }

</bundles_post_ra>
